<compile_context>
chip_gen: v7x
topology: tpu7x:2x2x1
jax: 0.10.0
libtpu: 0.0.40
codegen_flags: <defaults>
</compile_context>

<pallas_src>
import math

import jax
import jax.numpy as jnp
from jax.experimental import pallas as pl
from jax.experimental.pallas import tpu as pltpu


def _round_up(a, m):
    return ((a + m - 1) // m) * m


def rbf_kernel(x_ref, neg2c_ref, ones_ref, csq_ref, o_ref):
    # x_ref:     (tbr, gD)  packed batch tile
    # neg2c_ref: (gD, tn)   block-diagonal (-2 * centers^T) tile
    # ones_ref:  (gD, tn)   block-diagonal ones tile (segmented ||x||^2 via MXU)
    # csq_ref:   (1, tn)    precomputed ||c||^2 row (hoisted out of the kernel)
    # o_ref:     (tbr, tn)  lane-dense output tile
    x = x_ref[...]
    cross = jnp.dot(x, neg2c_ref[...], preferred_element_type=jnp.float32)
    xsq = jnp.dot(x * x, ones_ref[...], preferred_element_type=jnp.float32)
    # Clamp at 0: the norm decomposition can go slightly negative when a row of
    # x is very close to a center (cancellation); true squared distances are >= 0.
    o_ref[...] = jnp.maximum(xsq + csq_ref[...] + cross, 0.0)


def _choose_packing(O, D):
    """Return (g, O_pad): fold g batch rows per output row, pad O to O_pad."""
    g = 128 // math.gcd(O, 128)          # smallest g with (g * O) % 128 == 0
    if g > 1 and g * O <= 512 and g * D <= 1024:
        return g, O                      # exact packing, no column padding
    if O % 128 == 0:
        return 1, O
    return 1, _round_up(O, 128)          # pad columns; padding sliced off later


def _choose_tn(n, g_d):
    # Output-column tile: full if small, else a 128-multiple that keeps the
    # resident centers tiles modest.
    if n <= 512:
        return n
    for tn in (512, 256, 128):
        if n % tn == 0 and 4 * g_d * tn * 4 <= (8 << 20):
            return tn
    return 128  # n is always a multiple of 128 by construction


def _choose_tbr(b_r, g_d, tn):
    # Packed-batch tile: as large as possible under a ~20 MiB tile budget
    # (safe for v5e/v6e/v7x scoped VMEM with the 32 MiB limit set below).
    budget = 20 << 20
    resident = 4 * g_d * tn * 4          # neg2c + ones tiles, double-buffered
    per_row = 2 * (g_d + tn) * 4         # x tile + out tile, double-buffered
    cap = max(8, (budget - resident) // per_row)
    tbr = min(512, cap, _round_up(b_r, 8))
    return max(8, (tbr // 8) * 8)


def euclidean_rbf(x, centers):
    """Squared Euclidean distances between rows of x and rows of centers."""
    x = jnp.asarray(x, jnp.float32)
    centers = jnp.asarray(centers, jnp.float32)
    B, D = x.shape
    O, D2 = centers.shape
    assert D == D2

    g, O_pad = _choose_packing(O, D)
    N = g * O_pad                  # packed output width (lane axis), % 128 == 0
    gD = g * D                     # packed contraction width
    tn = _choose_tn(N, gD)
    B_r = pl.cdiv(B, g)            # packed batch rows needed
    tbr = _choose_tbr(B_r, gD, tn)
    B_r_pad = _round_up(B_r, tbr)
    B_pad = B_r_pad * g

    # --- One-off wrapper-side preprocessing (hoisted out of the grid loop) ---
    x_pad = jnp.pad(x, ((0, B_pad - B), (0, 0)))
    x_r = x_pad.reshape(B_r_pad, gD)                        # row-major: free
    centers_p = jnp.pad(centers, ((0, O_pad - O), (0, 0)))  # zero rows if padded
    eye_g = jnp.eye(g, dtype=jnp.float32)
    neg2c_blk = jnp.kron(eye_g, -2.0 * centers_p.T)         # (gD, N) block-diag
    ones_blk = jnp.kron(eye_g, jnp.ones((D, O_pad), jnp.float32))
    c_sq = jnp.sum(centers_p * centers_p, axis=1)           # (O_pad,) hoisted ||c||^2
    c_sq_row = jnp.tile(c_sq, g).reshape(1, N)

    grid = (B_r_pad // tbr, N // tn)

    out_r = pl.pallas_call(
        rbf_kernel,
        out_shape=jax.ShapeDtypeStruct((B_r_pad, N), jnp.float32),
        grid_spec=pltpu.PrefetchScalarGridSpec(
            num_scalar_prefetch=0,
            grid=grid,
            in_specs=[
                pl.BlockSpec((tbr, gD), lambda i, j: (i, 0)),   # packed x tile
                pl.BlockSpec((gD, tn), lambda i, j: (0, j)),    # -2*centers (blockdiag)
                pl.BlockSpec((gD, tn), lambda i, j: (0, j)),    # ones (blockdiag)
                pl.BlockSpec((1, tn), lambda i, j: (0, j)),     # ||c||^2 row
            ],
            out_specs=pl.BlockSpec((tbr, tn), lambda i, j: (i, j)),
        ),
        compiler_params=pltpu.CompilerParams(
            dimension_semantics=("parallel", "parallel"),
            vmem_limit_bytes=32 * 1024 * 1024,
        ),
    )(x_r, neg2c_blk, ones_blk, c_sq_row)

    # Undo the lane packing (free row-major reshape), drop batch / column padding.
    return out_r.reshape(B_pad, O_pad)[:B, :O]


if __name__ == "__main__":
    in_features = 32
    out_features = 16
    batch = 16

    key = jax.random.PRNGKey(0)
    kx, kc = jax.random.split(key)

    x = jax.random.normal(kx, (batch, in_features), dtype=jnp.float32)
    # centers = 2 * randint(0, 2) - 1  -> values in {-1, +1}, deterministic
    centers = (2 * jax.random.randint(kc, (out_features, in_features), 0, 2)
               - 1).astype(jnp.float32)

    out = euclidean_rbf(x, centers)
    out = jax.block_until_ready(out)

    # Reference check (plain JAX, same semantics as the PyTorch module).
    ref = jnp.sum((x[:, None, :] - centers[None, :, :]) ** 2, axis=-1)
    assert out.shape == (batch, out_features)
    assert jnp.allclose(out, ref, rtol=1e-4, atol=1e-3), "mismatch vs reference"

    print("KERNEL_OK")
</pallas_src>

<mosaic_0001>
module attributes {stable_mosaic.version = 11 : i64} {
  func.func @rbf_kernel(%arg0: i32, %arg1: i32, %arg2: memref<8x256xf32, #tpu.memory_space<vmem>>, %arg3: memref<256x128xf32, #tpu.memory_space<vmem>>, %arg4: memref<256x128xf32, #tpu.memory_space<vmem>>, %arg5: memref<1x128xf32, #tpu.memory_space<vmem>>, %arg6: memref<8x128xf32, #tpu.memory_space<vmem>>) attributes {dimension_semantics = [#tpu.dimension_semantics<parallel>, #tpu.dimension_semantics<parallel>], iteration_bounds = array<i64: 1, 1>, scalar_prefetch = 0 : i64, scratch_operands = 0 : i64, tpu.core_type = #tpu.core_type<tc>, window_params = [{transform_indices = @transform_0, window_bounds = array<i64: 8, 256>}, {transform_indices = @transform_1, window_bounds = array<i64: 256, 128>}, {transform_indices = @transform_2, window_bounds = array<i64: 256, 128>}, {transform_indices = @transform_3, window_bounds = array<i64: 1, 128>}, {transform_indices = @transform_4, window_bounds = array<i64: 8, 128>}]} {
    %c0 = arith.constant 0 : index
    %c0_0 = arith.constant 0 : index
    %0 = vector.load %arg2[%c0, %c0_0] : memref<8x256xf32, #tpu.memory_space<vmem>>, vector<8x256xf32>
    %c0_1 = arith.constant 0 : index
    %c0_2 = arith.constant 0 : index
    %1 = vector.load %arg3[%c0_1, %c0_2] : memref<256x128xf32, #tpu.memory_space<vmem>>, vector<256x128xf32>
    %cst = arith.constant dense<0.000000e+00> : vector<8x128xf32>
    %2 = tpu.matmul %0, %1, %cst {dimension_numbers = #tpu.dot_dimension_numbers<[1], [0], [0], [1], [0, 0, 1, 1], [], []>} : vector<8x256xf32>, vector<256x128xf32>, vector<8x128xf32> -> vector<8x128xf32>
    %3 = arith.mulf %0, %0 : vector<8x256xf32>
    %c0_3 = arith.constant 0 : index
    %c0_4 = arith.constant 0 : index
    %4 = vector.load %arg4[%c0_3, %c0_4] : memref<256x128xf32, #tpu.memory_space<vmem>>, vector<256x128xf32>
    %cst_5 = arith.constant dense<0.000000e+00> : vector<8x128xf32>
    %5 = tpu.matmul %3, %4, %cst_5 {dimension_numbers = #tpu.dot_dimension_numbers<[1], [0], [0], [1], [0, 0, 1, 1], [], []>} : vector<8x256xf32>, vector<256x128xf32>, vector<8x128xf32> -> vector<8x128xf32>
    %c0_6 = arith.constant 0 : index
    %c0_7 = arith.constant 0 : index
    %6 = vector.load %arg5[%c0_6, %c0_7] : memref<1x128xf32, #tpu.memory_space<vmem>>, vector<1x128xf32>
    %7 = vector.broadcast %6 : vector<1x128xf32> to vector<8x128xf32>
    %8 = arith.addf %5, %7 : vector<8x128xf32>
    %9 = arith.addf %8, %2 : vector<8x128xf32>
    %cst_8 = arith.constant 0.000000e+00 : f32
    %10 = vector.broadcast %cst_8 : f32 to vector<8x128xf32>
    %11 = arith.maximumf %9, %10 : vector<8x128xf32>
    %c0_9 = arith.constant 0 : index
    %c0_10 = arith.constant 0 : index
    %12 = vector.load %arg6[%c0_9, %c0_10] : memref<8x128xf32, #tpu.memory_space<vmem>>, vector<8x128xf32>
    tpu.vector_store %arg6[%c0_9, %c0_10], %11 {strides = array<i32>} : memref<8x128xf32, #tpu.memory_space<vmem>>, vector<8x128xf32>,
    return
  }
  func.func @transform_0(%arg0: i32, %arg1: i32) -> (i32, i32) {
    %c0_i32 = arith.constant 0 : i32
    %c0_i32_0 = arith.constant 0 : i32
    return %arg0, %c0_i32 : i32, i32
  }
  func.func @transform_1(%arg0: i32, %arg1: i32) -> (i32, i32) {
    %c0_i32 = arith.constant 0 : i32
    %c0_i32_0 = arith.constant 0 : i32
    return %c0_i32, %arg1 : i32, i32
  }
  func.func @transform_2(%arg0: i32, %arg1: i32) -> (i32, i32) {
    %c0_i32 = arith.constant 0 : i32
    %c0_i32_0 = arith.constant 0 : i32
    return %c0_i32, %arg1 : i32, i32
  }
  func.func @transform_3(%arg0: i32, %arg1: i32) -> (i32, i32) {
    %c0_i32 = arith.constant 0 : i32
    %c0_i32_0 = arith.constant 0 : i32
    return %c0_i32, %arg1 : i32, i32
  }
  func.func @transform_4(%arg0: i32, %arg1: i32) -> (i32, i32) {
    %c0_i32 = arith.constant 0 : i32
    return %arg0, %arg1 : i32, i32
  }
}

</mosaic_0001>

<bundles_post_ra>
// kernel: tpu_custom_call.1
= control target key start
LH: loop header
LB: loop body
LE: loop exit
PB: predicated region body
PF: predicated region fallthrough
CT: control target
= control target key end

     0   :  { %9 = vsyncpa [#allocation3], 0  ;;  %s614_s0 = inlined_call_operand.hbm [shape: f32[8,256], index: 0, kind: input, shape index: {}]   ;;  %s615_s1 = inlined_call_operand.hbm [shape: f32[256,128], index: 1, kind: input, shape index: {}]   ;;  %s616_s2 = inlined_call_operand.hbm [shape: f32[256,128], index: 2, kind: input, shape index: {}]   ;;  %s617_s3 = inlined_call_operand.vmem [shape: f32[1,128], index: 3, kind: input, shape index: {}]   ;;  %s618_s4 = inlined_call_operand.hbm [shape: f32[8,128], index: 4, kind: output, shape index: {}]  }
   0x1   :  { %10 = vsyncpa [#allocation6], 0 }
   0x2   :  { %11 = vsyncpa [#allocation4], 0  ;;  %s526_s15 = smov [#allocation5]   ;;  %s432_s19 = scalar_lea.hbm %s615_s1, 4096 }
   0x3   :  { %s27_s16 = sshll.u32 %s526_s15, 4  ;;  %p433_p0 = scmp.ne.s32.totalorder %s615_s1, %s432_s19  ;;  %s28_s16 = int_to_ptr.vmem [resolvable:$true] %s27_s16 }
   0x4   :  { %p436_p1 = scmp.lt.u32.totalorder %s432_s19, %s615_s1 }
   0x6   :  { %p438_p2 = pnand %p436_p1, %p433_p0 }
   0x8   :  { %441 = shalt.err (!%p438_p2)
}
   0x9   :  { %s442_s24 = scalar_lea.vmem %s28_s16, 4096  ;;  %p447_p4 = scmp.lt.s32.totalorder %s28_s16, %s28_s16 }
   0xa   :  { %p443_p3 = scmp.ne.s32.totalorder %s28_s16, %s442_s24  ;;  %p448_p5 = scmp.lt.s32.totalorder %s442_s24, %s442_s24 }
   0xc   :  { %p449_p6 = por %p448_p5, %p447_p4 }
   0xe   :  { %p450_p7 = pnand %p449_p6, %p443_p3 }
  0x10   :  { %453 = shalt.err (!%p450_p7)
}
  0x11   :  { %s527_s25 = smov 128   ;;  %s528_s26 = smov 8  }
  0x12   :  { %33 = dma.hbm_to_vmem [thread:$0]  %s615_s1, 4096, %s28_s16, [#allocation6], %s527_s25, %s527_s25, %s528_s26  }
  0x13   :  { %s529_s29 = smov [#allocation2]   ;;  %s530_s5 = smov [#allocation7]  }
  0x14   :  { %s18_s30 = sshll.u32 %s529_s29, 4  ;;  %s39_s6 = sshll.u32 %s530_s5, 4  ;;  %s19_s30 = int_to_ptr.vmem [resolvable:$true] %s18_s30  ;;  %s40_s6 = int_to_ptr.vmem [resolvable:$true] %s39_s6 }
  0x15   :  { %s454_s9 = scalar_lea.hbm %s614_s0, 256 }
  0x16   :  { %p455_p8 = scmp.ne.s32.totalorder %s614_s0, %s454_s9  ;;  %p458_p9 = scmp.lt.u32.totalorder %s454_s9, %s614_s0 }
  0x18   :  { %p460_p10 = pnand %p458_p9, %p455_p8 }
  0x1a   :  { %463 = shalt.err (!%p460_p10)
}
  0x1b   :  { %s464_s1 = scalar_lea.vmem %s19_s30, 256  ;;  %p469_p12 = scmp.lt.s32.totalorder %s19_s30, %s19_s30 }
  0x1c   :  { %p465_p11 = scmp.ne.s32.totalorder %s19_s30, %s464_s1  ;;  %p470_p13 = scmp.lt.s32.totalorder %s464_s1, %s464_s1 }
  0x1e   :  { %p471_p0 = por %p470_p13, %p469_p12 }
  0x20   :  { %p472_p1 = pnand %p471_p0, %p465_p11 }
  0x22   :  { %475 = shalt.err (!%p472_p1)
}
  0x23   :  { %21 = dma.hbm_to_vmem [thread:$0]  %s614_s0, 256, %s19_s30, [#allocation3]  }
  0x24   :  { %s476_s18 = scalar_lea.hbm %s616_s2, 4096 }
  0x25   :  { %p477_p2 = scmp.ne.s32.totalorder %s616_s2, %s476_s18  ;;  %p480_p3 = scmp.lt.u32.totalorder %s476_s18, %s616_s2 }
  0x27   :  { %p482_p4 = pnand %p480_p3, %p477_p2 }
  0x29   :  { %485 = shalt.err (!%p482_p4)
}
  0x2a   :  { %s486_s23 = scalar_lea.vmem %s40_s6, 4096  ;;  %p491_p6 = scmp.lt.s32.totalorder %s40_s6, %s40_s6 }
  0x2b   :  { %p487_p5 = scmp.ne.s32.totalorder %s40_s6, %s486_s23  ;;  %p492_p7 = scmp.lt.s32.totalorder %s486_s23, %s486_s23 }
  0x2d   :  { %p493_p8 = por %p492_p7, %p491_p6 }
  0x2f   :  { %p494_p9 = pnand %p493_p8, %p487_p5 }
  0x31   :  { %497 = shalt.err (!%p494_p9)
}
  0x32   :  { %45 = dma.hbm_to_vmem [thread:$0]  %s616_s2, 4096, %s40_s6, [#allocation6], %s527_s25, %s527_s25, %s528_s26  }
  0x33   :  { %520 = dma.done.wait [#allocation3], 256  }
  0x34   :  { %521 = vsyncadd [#allocation3], 4294967040 }
  0x35   :  { %522 = dma.done.wait [#allocation6], 8192  }
  0x36   :  { %523 = vsyncadd [#allocation6], 4294959104  ;;  %v179_v0 = vld [vmem:[#allocation7 + $0x80] sm:$0xff]  ;;  %v180_v1 = vld [vmem:[#allocation7 + $0x88] sm:$0xff]  ;;  %s531_s26 = smov [#allocation8]  }
  0x37   :  { %v75_v2 = vld [vmem:[#allocation5 + $0x80] sm:$0xff]  ;;  %v394_v3 = vpack.c.bf16 %v180_v1, %v179_v0  ;;  %v76_v4 = vld [vmem:[#allocation5 + $0x88] sm:$0xff]  ;;  %v181_v11 = vld [vmem:[#allocation7 + $0x90] sm:$0xff]  ;;  %s281_s27 = sshll.u32 %s531_s26, 4  ;;  %s282_s27 = int_to_ptr.vmem [resolvable:$true] %s281_s27 }
  0x38   :  { %v163_v5 = vld [vmem:[#allocation7] sm:$0xff]  ;;  %v164_v6 = vld [vmem:[#allocation7 + $0x8] sm:$0xff]  ;;  %v362_v7 = vpack.c.bf16 %v76_v4, %v75_v2  ;;  %v182_v13 = vld [vmem:[#allocation7 + $0x98] sm:$0xff]  ;;  %s498_s28 = scalar_lea.vmem %s282_s27, 128  ;;  %p503_p11 = scmp.lt.s32.totalorder %s282_s27, %s282_s27 }
  0x39   :  { %v396_v8 = vpack.c.bf16 %v164_v6, %v163_v5  ;;  %v59_v9 = vld [vmem:[#allocation5] sm:$0xff]  ;;  %v60_v10 = vld [vmem:[#allocation5 + $0x8] sm:$0xff]  ;;  %395 = vmatprep.subr.bf16.mxu1 %v394_v3  ;;  %v77_v14 = vld [vmem:[#allocation5 + $0x90] sm:$0xff]  ;;  %v398_v16 = vpack.c.bf16 %v182_v13, %v181_v11  ;;  %p499_p10 = scmp.ne.s32.totalorder %s282_s27, %s498_s28  ;;  %p504_p12 = scmp.lt.s32.totalorder %s498_s28, %s498_s28 }
  0x3a   :  { %v364_v12 = vpack.c.bf16 %v60_v10, %v59_v9  ;;  %v78_v15 = vld [vmem:[#allocation5 + $0x98] sm:$0xff]  ;;  %363 = vmatprep.subr.bf16.mxu0 %v362_v7  ;;  %v165_v18 = vld [vmem:[#allocation7 + $0x10] sm:$0xff]  ;;  %v183_v23 = vld [vmem:[#allocation7 + $0xa0] sm:$0xff] }
  0x3b   :  { %397 = vmatpush3.bf16.msra.mxu1 %v396_v8  ;;  %v366_v17 = vpack.c.bf16 %v78_v15, %v77_v14  ;;  %v166_v19 = vld [vmem:[#allocation7 + $0x18] sm:$0xff]  ;;  %v61_v20 = vld [vmem:[#allocation5 + $0x10] sm:$0xff]  ;;  %v184_v24 = vld [vmem:[#allocation7 + $0xa8] sm:$0xff]  ;;  %p505_p13 = por %p504_p12, %p503_p11 }
  0x3c   :  { %365 = vmatpush3.bf16.msra.mxu0 %v364_v12  ;;  %v400_v21 = vpack.c.bf16 %v166_v19, %v165_v18  ;;  %v62_v22 = vld [vmem:[#allocation5 + $0x18] sm:$0xff]  ;;  %399 = vmatprep.subr.bf16.mxu1 %v398_v16  ;;  %v402_v26 = vpack.c.bf16 %v184_v24, %v183_v23  ;;  %v79_v27 = vld [vmem:[#allocation5 + $0xa0] sm:$0xff]  ;;  %v80_v28 = vld [vmem:[#allocation5 + $0xa8] sm:$0xff] }
  0x3d   :  { %367 = vmatprep.subr.bf16.mxu0 %v366_v17  ;;  %v368_v25 = vpack.c.bf16 %v62_v22, %v61_v20  ;;  %v167_v29 = vld [vmem:[#allocation7 + $0x20] sm:$0xff]  ;;  %v370_v30 = vpack.c.bf16 %v80_v28, %v79_v27  ;;  %v168_v31 = vld [vmem:[#allocation7 + $0x28] sm:$0xff]  ;;  %v185_v35 = vld [vmem:[#allocation7 + $0xb0] sm:$0xff]  ;;  %p506_p0 = pnand %p505_p13, %p499_p10 }
  0x3e   :  { %v63_v32 = vld [vmem:[#allocation5 + $0x20] sm:$0xff]  ;;  %v64_v33 = vld [vmem:[#allocation5 + $0x28] sm:$0xff]  ;;  %v404_v34 = vpack.c.bf16 %v168_v31, %v167_v29  ;;  %v186_v36 = vld [vmem:[#allocation7 + $0xb8] sm:$0xff] }
  0x3f   :  { %401 = vmatpush3.bf16.msra.mxu1 %v400_v21  ;;  %v81_v37 = vld [vmem:[#allocation5 + $0xb0] sm:$0xff]  ;;  %v372_v38 = vpack.c.bf16 %v64_v33, %v63_v32  ;;  %v406_v39 = vpack.c.bf16 %v186_v36, %v185_v35  ;;  %v82_v40 = vld [vmem:[#allocation5 + $0xb8] sm:$0xff]  ;;  %v187_v46 = vld [vmem:[#allocation7 + $0xc0] sm:$0xff] }
  0x40   :  { %369 = vmatpush3.bf16.msra.mxu0 %v368_v25  ;;  %403 = vmatprep.subr.bf16.mxu1 %v402_v26  ;;  %v169_v41 = vld [vmem:[#allocation7 + $0x30] sm:$0xff]  ;;  %v170_v42 = vld [vmem:[#allocation7 + $0x38] sm:$0xff]  ;;  %v374_v43 = vpack.c.bf16 %v82_v40, %v81_v37  ;;  %v188_v47 = vld [vmem:[#allocation7 + $0xc8] sm:$0xff] }
  0x41   :  { %371 = vmatprep.subr.bf16.mxu0 %v370_v30  ;;  %v65_v44 = vld [vmem:[#allocation5 + $0x30] sm:$0xff]  ;;  %v66_v45 = vld [vmem:[#allocation5 + $0x38] sm:$0xff]  ;;  %v83_v48 = vld [vmem:[#allocation5 + $0xc0] sm:$0xff]  ;;  %v408_v50 = vpack.c.bf16 %v170_v42, %v169_v41  ;;  %v410_v52 = vpack.c.bf16 %v188_v47, %v187_v46 }
  0x42   :  { %v84_v49 = vld [vmem:[#allocation5 + $0xc8] sm:$0xff]  ;;  %v376_v51 = vpack.c.bf16 %v66_v45, %v65_v44  ;;  %v171_v53 = vld [vmem:[#allocation7 + $0x40] sm:$0xff]  ;;  %v189_v58 = vld [vmem:[#allocation7 + $0xd0] sm:$0xff] }
  0x43   :  { %405 = vmatpush3.bf16.msra.mxu1 %v404_v34  ;;  %v172_v54 = vld [vmem:[#allocation7 + $0x48] sm:$0xff]  ;;  %v67_v55 = vld [vmem:[#allocation5 + $0x40] sm:$0xff]  ;;  %v378_v56 = vpack.c.bf16 %v84_v49, %v83_v48  ;;  %v190_v59 = vld [vmem:[#allocation7 + $0xd8] sm:$0xff] }
  0x44   :  { %373 = vmatpush3.bf16.msra.mxu0 %v372_v38  ;;  %407 = vmatprep.subr.bf16.mxu1 %v406_v39  ;;  %v68_v57 = vld [vmem:[#allocation5 + $0x48] sm:$0xff]  ;;  %v85_v60 = vld [vmem:[#allocation5 + $0xd0] sm:$0xff]  ;;  %v86_v61 = vld [vmem:[#allocation5 + $0xd8] sm:$0xff]  ;;  %v412_v62 = vpack.c.bf16 %v172_v54, %v171_v53  ;;  %v414_v0 = vpack.c.bf16 %v190_v59, %v189_v58 }
  0x45   :  { %375 = vmatprep.subr.bf16.mxu0 %v374_v43  ;;  %v380_v63 = vpack.c.bf16 %v68_v57, %v67_v55  ;;  %v173_v1 = vld [vmem:[#allocation7 + $0x50] sm:$0xff]  ;;  %v174_v2 = vld [vmem:[#allocation7 + $0x58] sm:$0xff]  ;;  %v382_v4 = vpack.c.bf16 %v86_v61, %v85_v60  ;;  %v191_v6 = vld [vmem:[#allocation7 + $0xe0] sm:$0xff] }
  0x46   :  { %v69_v3 = vld [vmem:[#allocation5 + $0x50] sm:$0xff]  ;;  %v70_v5 = vld [vmem:[#allocation5 + $0x58] sm:$0xff]  ;;  %v192_v7 = vld [vmem:[#allocation7 + $0xe8] sm:$0xff]  ;;  %v416_v10 = vpack.c.bf16 %v174_v2, %v173_v1 }
  0x47   :  { %409 = vmatpush3.bf16.msra.mxu1 %v408_v50  ;;  %v87_v8 = vld [vmem:[#allocation5 + $0xe0] sm:$0xff]  ;;  %v88_v9 = vld [vmem:[#allocation5 + $0xe8] sm:$0xff]  ;;  %v384_v12 = vpack.c.bf16 %v70_v5, %v69_v3  ;;  %v418_v13 = vpack.c.bf16 %v192_v7, %v191_v6  ;;  %v58_v16 = vld [vmem:[#allocation2 + $0x8] sm:$0xff] }
  0x48   :  { %377 = vmatpush3.bf16.msra.mxu0 %v376_v51  ;;  %411 = vmatprep.subr.bf16.mxu1 %v410_v52  ;;  %v175_v11 = vld [vmem:[#allocation7 + $0x60] sm:$0xff]  ;;  %v176_v14 = vld [vmem:[#allocation7 + $0x68] sm:$0xff]  ;;  %v386_v17 = vpack.c.bf16 %v88_v9, %v87_v8  ;;  %v193_v19 = vld [vmem:[#allocation7 + $0xf0] sm:$0xff]  ;;  %v162_v21 = vmul.f32 %v58_v16, %v58_v16 }
  0x49   :  { %379 = vmatprep.subr.bf16.mxu0 %v378_v56  ;;  %v71_v15 = vld [vmem:[#allocation5 + $0x60] sm:$0xff]  ;;  %v72_v18 = vld [vmem:[#allocation5 + $0x68] sm:$0xff]  ;;  %v194_v20 = vld [vmem:[#allocation7 + $0xf8] sm:$0xff]  ;;  %155 = vmatprep.mubr.f32.mxu0 %v58_v16  ;;  %v420_v24 = vpack.c.bf16 %v176_v14, %v175_v11 }
  0x4a   :  { %v89_v22 = vld [vmem:[#allocation5 + $0xf0] sm:$0xff]  ;;  %v90_v23 = vld [vmem:[#allocation5 + $0xf8] sm:$0xff]  ;;  %266 = vmatprep.mubr.f32.mxu1 %v162_v21  ;;  %v388_v25 = vpack.c.bf16 %v72_v18, %v71_v15  ;;  %v422_v26 = vpack.c.bf16 %v194_v20, %v193_v19 }
  0x4b   :  { %413 = vmatpush3.bf16.msra.mxu1 %v412_v62  ;;  %v177_v27 = vld [vmem:[#allocation7 + $0x70] sm:$0xff]  ;;  %v178_v28 = vld [vmem:[#allocation7 + $0x78] sm:$0xff]  ;;  %v390_v29 = vpack.c.bf16 %v90_v23, %v89_v22 }
  0x4c   :  { %381 = vmatpush3.bf16.msra.mxu0 %v380_v63  ;;  %415 = vmatprep.subr.bf16.mxu1 %v414_v0  ;;  %v73_v30 = vld [vmem:[#allocation5 + $0x70] sm:$0xff]  ;;  %v74_v31 = vld [vmem:[#allocation5 + $0x78] sm:$0xff]  ;;  %v424_v32 = vpack.c.bf16 %v178_v28, %v177_v27 }
  0x4d   :  { %383 = vmatprep.subr.bf16.mxu0 %v382_v4  ;;  %v57_v33 = vld [vmem:[#allocation2] sm:$0xff]  ;;  %v392_v34 = vpack.c.bf16 %v74_v31, %v73_v30 }
  0x4e   :  { %v161_v35 = vmul.f32 %v57_v33, %v57_v33  ;;  %v291_v38 = vld [vmem:[%s617_s3] ss:$0 sm:$0xff] }
  0x4f   :  { %417 = vmatpush3.bf16.msra.mxu1 %v416_v10 }
  0x50   :  { %385 = vmatpush3.bf16.msra.mxu0 %v384_v12  ;;  %419 = vmatprep.subr.bf16.mxu1 %v418_v13 }
  0x51   :  { %387 = vmatprep.subr.bf16.mxu0 %v386_v17 }
  0x53   :  { %421 = vmatpush3.bf16.msra.mxu1 %v420_v24 }
  0x54   :  { %389 = vmatpush3.bf16.msra.mxu0 %v388_v25  ;;  %423 = vmatprep.subr.bf16.mxu1 %v422_v26 }
  0x55   :  { %391 = vmatprep.subr.bf16.mxu0 %v390_v29 }
  0x57   :  { %425 = vmatpush3.bf16.msra.mxu1 %v424_v32 }
  0x58   :  { %393 = vmatpush3.bf16.msra.mxu0 %v392_v34 }
  0x5a   :  { %267 = vmatmul.mubr.f32.vlgmr.msra.gmra.mrb[0].mxu1 %v161_v35 }
  0x5b   :  { %156 = vmatmul.mubr.f32.vlgmr.msra.gmra.mrb[0].mxu0 %v57_v33 }
 0x12d   :  { %v359_v36 = vpop.f32.mrb[0].mxu1 }
 0x12e   :  { %v324_v37 = vpop.f32.mrb[0].mxu0  ;;  %v360_v39 = vpop.f32.mrb[1].mxu1 }
 0x12f   :  { %v361_v40 = vadd.f32 %v360_v39, %v359_v36  ;;  %v325_v41 = vpop.f32.mrb[1].mxu0 }
 0x130   :  { %v326_v42 = vadd.f32 %v325_v41, %v324_v37 }
 0x131   :  { %v269_v43 = vadd.f32 %v361_v40, %v291_v38 }
 0x133   :  { %v272_v44 = vadd.f32 %v326_v42, %v269_v43 }
 0x135   :  { %v273_v45 = vmax.f32 %v272_v44, 0.0 }
 0x137   :  { %274 = vst [vmem:[#allocation8] sm:$0xff] %v273_v45 }
 0x138   :  { %509 = shalt.err (!%p506_p0)
}
 0x139   :  { %s510_s30 = scalar_lea.hbm %s618_s4, 128 }
 0x13a   :  { %p511_p1 = scmp.ne.s32.totalorder %s618_s4, %s510_s30  ;;  %p514_p2 = scmp.lt.u32.totalorder %s510_s30, %s618_s4 }
 0x13c   :  { %p516_p3 = pnand %p514_p2, %p511_p1 }
 0x13e   :  { %519 = shalt.err (!%p516_p3)
}
 0x13f   :  { %284 = dma.vmem_to_hbm [thread:$0]  %s282_s27, 128, %s618_s4, [#allocation4]  }
 0x140   :  { %524 = dma.done.wait [#allocation4], 128  }
 0x141   :  { %525 = vsyncadd [#allocation4], 4294967168 }
 0x142   :  { %288 = vsyncpa [#allocation3], 1 }
 0x143   :  { %289 = vsyncpa [#allocation6], 1 }
 0x144   :  { %290 = vsyncpa [#allocation4], 1 }

</bundles_post_ra>
